<compile_context>
chip_gen: v6e
topology: v6e:2x2x1
jax: 0.10.0
libtpu: 0.0.40
codegen_flags: <defaults>
</compile_context>

<pallas_src>
import jax
import jax.numpy as jnp
from jax import lax
from jax.experimental import pallas as pl
from jax.experimental.pallas import tpu as pltpu


# ----------------------------------------------------------------------------
# Helpers: VMEM budget + tiling
# ----------------------------------------------------------------------------
def _round_up(x, m):
    return -(-x // m) * m


def _vmem_limit_bytes():
    phys = 64 * 1024 * 1024  # v7x-safe default if the query is unavailable
    try:
        info = pltpu.get_tpu_info()
        phys = int(getattr(info, "vmem_capacity_bytes", phys))
    except Exception:
        pass
    # ~75% of physical, capped at 96 MiB (v5e/v6e have 128 MiB, v7x has 64 MiB)
    return min(phys * 3 // 4, 96 * 1024 * 1024)


def _pick_tiling(n, vmem_limit):
    """Pick (n_pad, tile_q) so the attention kernel's resident VMEM fits."""
    n8 = _round_up(max(n, 8), 8)
    if n8 <= 512:
        return n8, n8  # single grid step, full-dim blocks
    n128 = _round_up(n, 128)
    # N-scaling residents (2 pipeline buffers each):
    #   h(+ones) bf16, lane-padded to 128 : 2 * n * 128 * 2
    #   alpha_src rows [8(pad), n] f32    : 2 * 8 * n * 4
    fixed = 2 * n128 * 128 * 2 + 2 * 8 * n128 * 4
    headroom = 4 * 1024 * 1024  # weights, bias, compiler scratch
    budget = vmem_limit - fixed - headroom
    # Per target-row cost: int8 adj (x2 buffers), alpha_dst/out lane-padded
    # tiles (x2 buffers) and ~5 live f32 [., n] temporaries in the head loop.
    per_row = 2 * n128 + 4 * 128 * 4 + 5 * 4 * n128
    if budget < per_row * 128:
        tile = 128
        # TODO(synk): for very large N also tile the source axis (online
        # softmax) and skip all-zero adjacency blocks via scalar-prefetched
        # block flags; the dense [tq, N] formulation cannot fit otherwise.
    else:
        tile = min(n128, budget // per_row // 128 * 128)
    return _round_up(n, tile), tile


# ----------------------------------------------------------------------------
# Kernel 1: per-layer linear transform + attention coefficients
# ----------------------------------------------------------------------------
def _transform_kernel(x_ref, w_ref, ones_ref, thsT_ref, thd_ref,
                      h_ref, asrc_ref, adst_ref):
    xb = x_ref[...].astype(jnp.bfloat16)                          # [tr, Fin]
    # Fused all-heads transform; ones_ref puts a 1.0 column after each head's
    # C feature columns so p @ [h | 1] later yields the softmax row-sum.
    h = jnp.dot(xb, w_ref[...], preferred_element_type=jnp.float32)
    h_ref[...] = (h + ones_ref[...]).astype(jnp.bfloat16)         # [tr, H*(C+1)]
    # alpha_src in row layout [H, tr]:  asrc[h, j] = theta_src[h] . x[j]
    asrc_ref[...] = lax.dot_general(
        thsT_ref[...], xb, (((1,), (1,)), ((), ())),
        preferred_element_type=jnp.float32)
    # alpha_dst in column layout [tr, H]
    adst_ref[...] = jnp.dot(xb, thd_ref[...],
                            preferred_element_type=jnp.float32)


def _transform(x, w_aug, ones_pat, thsT, thd, *, tile_q, vmem_limit):
    n_pad, fin = x.shape
    H = thsT.shape[0]
    hcp = w_aug.shape[1]
    grid = (n_pad // tile_q,)
    return pl.pallas_call(
        _transform_kernel,
        grid=grid,
        in_specs=[
            pl.BlockSpec((tile_q, fin), lambda r: (r, 0)),   # x rows
            pl.BlockSpec((fin, hcp), lambda r: (0, 0)),      # W_aug (bf16)
            pl.BlockSpec((1, hcp), lambda r: (0, 0)),        # ones-column pattern
            pl.BlockSpec((H, fin), lambda r: (0, 0)),        # theta_src^T (bf16)
            pl.BlockSpec((fin, H), lambda r: (0, 0)),        # theta_dst   (bf16)
        ],
        out_specs=[
            pl.BlockSpec((tile_q, hcp), lambda r: (r, 0)),   # h (+ones) bf16
            pl.BlockSpec((H, tile_q), lambda r: (0, r)),     # alpha_src rows
            pl.BlockSpec((tile_q, H), lambda r: (r, 0)),     # alpha_dst cols
        ],
        out_shape=(
            jax.ShapeDtypeStruct((n_pad, hcp), jnp.bfloat16),
            jax.ShapeDtypeStruct((H, n_pad), jnp.float32),
            jax.ShapeDtypeStruct((n_pad, H), jnp.float32),
        ),
        compiler_params=pltpu.CompilerParams(
            dimension_semantics=("parallel",),
            vmem_limit_bytes=vmem_limit),
    )(x, w_aug, ones_pat, thsT, thd)


# ----------------------------------------------------------------------------
# Kernel 2: masked multi-head attention + bias + ELU (target-row tiled)
# ----------------------------------------------------------------------------
def _make_attn_kernel(H, C, out_pad):
    Cp = C + 1
    HC = H * C

    def kernel(adj_ref, adst_ref, h_ref, asrc_ref, bias_ref, o_ref):
        # Hoisted edge mask (int8 adj -> compare once; no arithmetic mask).
        mask = adj_ref[...].astype(jnp.float32) > 0.0            # [tq, N]
        adt = adst_ref[...]                                      # [tq, H]
        asrc = asrc_ref[...]                                     # [H, N]
        heads = []
        # H is a small compile-time constant; unrolling keeps each head's
        # [tq, C] result in registers (no masked sub-128-lane scratch stores).
        for hh in range(H):
            e = adt[:, hh:hh + 1] + asrc[hh:hh + 1, :]           # [tq, N]
            e = jnp.maximum(e, 0.2 * e)                          # LeakyReLU(0.2)
            e = jnp.where(mask, e, -1e30)                        # mask non-edges
            m = jnp.max(e, axis=-1, keepdims=True)
            p = jnp.exp(e - m).astype(jnp.bfloat16)              # unnormalized
            # [tq, C+1]: last column = softmax row-sum (ones column of h).
            acc = jnp.dot(p, h_ref[:, hh * Cp:(hh + 1) * Cp],
                          preferred_element_type=jnp.float32)
            heads.append(acc[:, :C] / acc[:, C:Cp])              # exact normalize
        out = jnp.concatenate(heads, axis=-1) + bias_ref[...]    # [tq, HC]
        # ELU (clamped exp so no inf even for large positive activations).
        out = jnp.where(out > 0, out, jnp.exp(jnp.minimum(out, 0.0)) - 1.0)
        if out_pad > HC:                                         # lane-dense store
            out = jnp.concatenate(
                [out, jnp.zeros((out.shape[0], out_pad - HC), out.dtype)],
                axis=-1)
        o_ref[...] = out

    return kernel


def _attention(adj_i8, adst, h_aug, asrc, bias2, *, H, C, tile_q, vmem_limit):
    n_pad = adj_i8.shape[0]
    HC = H * C
    out_pad = _round_up(HC, 128)
    hcp = h_aug.shape[1]
    grid = (n_pad // tile_q,)
    return pl.pallas_call(
        _make_attn_kernel(H, C, out_pad),
        grid=grid,
        in_specs=[
            pl.BlockSpec((tile_q, n_pad), lambda q: (q, 0)),   # adj tile (int8)
            pl.BlockSpec((tile_q, H), lambda q: (q, 0)),       # alpha_dst tile
            pl.BlockSpec((n_pad, hcp), lambda q: (0, 0)),      # h (+ones), bf16
            pl.BlockSpec((H, n_pad), lambda q: (0, 0)),        # alpha_src rows
            pl.BlockSpec((1, HC), lambda q: (0, 0)),           # bias
        ],
        out_specs=pl.BlockSpec((tile_q, out_pad), lambda q: (q, 0)),
        out_shape=jax.ShapeDtypeStruct((n_pad, out_pad), jnp.float32),
        compiler_params=pltpu.CompilerParams(
            # No grid-carried scratch -> q tiles can shard across TensorCores.
            dimension_semantics=("parallel",),
            vmem_limit_bytes=vmem_limit),
    )(adj_i8, adst, h_aug, asrc, bias2)


# ----------------------------------------------------------------------------
# One GATConv layer (+ ELU)
# ----------------------------------------------------------------------------
def gat_layer(x, adj_i8, w, a_src, a_dst, bias, *, tile_q, vmem_limit):
    """w:[H,Fin,C] a_src,a_dst:[H,C] bias:[H*C].

    Returns lane-padded node features [n_pad, round_up(H*C, 128)] (f32).
    Note: concat=False with H>1 (mean over heads) is NOT supported in-kernel;
    the PyTorch model only uses concat=False with heads=1.
    """
    H, Fin, C = w.shape
    Cp = C + 1

    # Fold attention vectors into W (theta) and append a zero column per head;
    # ones_pat turns that column into 1.0 so p @ [h | 1] yields the row-sum.
    w_aug = jnp.transpose(jnp.pad(w, ((0, 0), (0, 0), (0, 1))), (1, 0, 2))
    w_aug = w_aug.reshape(Fin, H * Cp).astype(jnp.bfloat16)
    ones_pat = jnp.tile(
        jnp.concatenate([jnp.zeros((C,), jnp.float32),
                         jnp.ones((1,), jnp.float32)]), H).reshape(1, H * Cp)
    thsT = jnp.einsum("hfc,hc->hf", w, a_src).astype(jnp.bfloat16)   # [H, Fin]
    thd = jnp.einsum("hfc,hc->fh", w, a_dst).astype(jnp.bfloat16)    # [Fin, H]
    bias2 = bias.reshape(1, H * C)

    h_aug, asrc, adst = _transform(x, w_aug, ones_pat, thsT, thd,
                                   tile_q=tile_q, vmem_limit=vmem_limit)
    return _attention(adj_i8, adst, h_aug, asrc, bias2,
                      H=H, C=C, tile_q=tile_q, vmem_limit=vmem_limit)


# ----------------------------------------------------------------------------
# Kernel 3: global_mean_pool + Linear (accumulating over node tiles)
# ----------------------------------------------------------------------------
def _pool_fc_kernel(pool_ref, x_ref, w_ref, b_ref, y_ref):
    @pl.when(pl.program_id(0) == 0)
    def _():
        y_ref[...] = jnp.zeros_like(y_ref)

    pooled = jnp.dot(pool_ref[...], x_ref[...],
                     preferred_element_type=jnp.float32)          # [B, 128]
    y_ref[...] += jnp.dot(pooled, w_ref[...],
                          preferred_element_type=jnp.float32)     # [B, 1]

    @pl.when(pl.program_id(0) == pl.num_programs(0) - 1)
    def _():
        y_ref[...] += b_ref[...]


def pool_fc(pool, x_pad, fc_w_pad, fc_b, *, tile_q, vmem_limit):
    B, n_pad = pool.shape
    d = x_pad.shape[1]
    grid = (n_pad // tile_q,)
    return pl.pallas_call(
        _pool_fc_kernel,
        grid=grid,
        in_specs=[
            pl.BlockSpec((B, tile_q), lambda q: (0, q)),
            pl.BlockSpec((tile_q, d), lambda q: (q, 0)),
            pl.BlockSpec((d, 1), lambda q: (0, 0)),
            pl.BlockSpec((1, 1), lambda q: (0, 0)),
        ],
        out_specs=pl.BlockSpec((B, 1), lambda q: (0, 0)),
        out_shape=jax.ShapeDtypeStruct((B, 1), jnp.float32),
        compiler_params=pltpu.CompilerParams(
            dimension_semantics=("arbitrary",),   # grid-carried accumulator
            vmem_limit_bytes=vmem_limit),
    )(pool, x_pad, fc_w_pad, fc_b)


# ----------------------------------------------------------------------------
# Full GAT forward
# ----------------------------------------------------------------------------
def gat_forward(x, adj, pool, params):
    """x:[N,Fin] f32, adj:[N,N] 0/1 (self-loops included), pool:[B,N]."""
    n = x.shape[0]
    vmem_limit = _vmem_limit_bytes()
    n_pad, tile_q = _pick_tiling(n, vmem_limit)
    pad = n_pad - n

    x_p = jnp.pad(x, ((0, pad), (0, 0)))
    adj_i8 = jnp.pad(adj, ((0, pad), (0, pad))).astype(jnp.int8)  # 4x less DMA
    pool_p = jnp.pad(pool, ((0, 0), (0, pad)))                    # padded nodes get 0 weight

    def hc(layer):
        w = params[layer][0]
        return w.shape[0] * w.shape[2]

    kw = dict(tile_q=tile_q, vmem_limit=vmem_limit)
    h = gat_layer(x_p, adj_i8, *params["conv1"], **kw)[:, :hc("conv1")]
    h = gat_layer(h, adj_i8, *params["conv2"], **kw)[:, :hc("conv2")]
    h = gat_layer(h, adj_i8, *params["conv3"], **kw)   # stays lane-padded [n_pad, 128]

    # TODO(synk): F.dropout(p=0.5) implemented as eval-mode identity (no RNG drop).
    fc_w_pad = jnp.pad(params["fc_w"],
                       ((0, h.shape[1] - params["fc_w"].shape[0]), (0, 0)))
    return pool_fc(pool_p, h, fc_w_pad, params["fc_b"], **kw)


# ----------------------------------------------------------------------------
# Pure-JAX reference (same math) for a sanity check
# ----------------------------------------------------------------------------
def _gat_layer_ref(x, adj, w, a_src, a_dst, bias, concat):
    H = w.shape[0]
    outs = []
    for hh in range(H):
        h = x @ w[hh]
        ad = jnp.sum(h * a_dst[hh][None, :], -1, keepdims=True)
        asr = jnp.sum(h * a_src[hh][None, :], -1, keepdims=True)
        e = ad + asr.T
        e = jnp.where(e > 0, e, 0.2 * e)
        e = jnp.where(adj > 0, e, -1e30)
        p = jax.nn.softmax(e, axis=-1)
        outs.append(p @ h)
    out = jnp.concatenate(outs, -1) if concat else sum(outs) / H
    return jax.nn.elu(out + bias[None, :])


def _gat_forward_ref(x, adj, pool, params):
    x = _gat_layer_ref(x, adj, *params["conv1"], concat=True)
    x = _gat_layer_ref(x, adj, *params["conv2"], concat=True)
    x = _gat_layer_ref(x, adj, *params["conv3"], concat=False)
    return (pool @ x) @ params["fc_w"] + params["fc_b"]


# ----------------------------------------------------------------------------
if __name__ == "__main__":
    # Small synthetic graph batch: 2 ring graphs of 8 nodes each, 16 nodes total.
    N, B = 16, 2
    in_channels, hidden, heads = 8, 8, 4

    srcs, dsts = [], []
    for g in range(B):
        off = g * 8
        for i in range(8):
            srcs += [off + i, off + (i + 1) % 8]
            dsts += [off + (i + 1) % 8, off + i]
    edge_index = jnp.array([srcs, dsts], dtype=jnp.int32)   # [2, E]
    batch = jnp.array([0] * 8 + [1] * 8, dtype=jnp.int32)   # [N]

    # Dense adjacency mask [target, source] with self-loops (GATConv default).
    adj = jnp.zeros((N, N), jnp.float32)
    adj = adj.at[edge_index[1], edge_index[0]].set(1.0)
    adj = adj.at[jnp.arange(N), jnp.arange(N)].set(1.0)

    # Mean-pool matrix [B, N]: pool[b, n] = 1/|graph b| if node n in graph b.
    onehot = (batch[None, :] == jnp.arange(B)[:, None]).astype(jnp.float32)
    pool = onehot / jnp.sum(onehot, axis=1, keepdims=True)

    # Deterministic parameters.
    key = jax.random.PRNGKey(0)
    keys = jax.random.split(key, 16)

    def init(k, shape, scale=0.1):
        return scale * jax.random.normal(k, shape, jnp.float32)

    def conv_params(kw, ks, kd, kb, h, fin, c):
        return (init(kw, (h, fin, c)),       # W per head
                init(ks, (h, c)),            # att_src
                init(kd, (h, c)),            # att_dst
                init(kb, (h * c,)))          # bias

    params = {
        "conv1": conv_params(keys[0], keys[1], keys[2], keys[3],
                             heads, in_channels, hidden),
        "conv2": conv_params(keys[4], keys[5], keys[6], keys[7],
                             heads, hidden * heads, hidden),
        "conv3": conv_params(keys[8], keys[9], keys[10], keys[11],
                             1, hidden * heads, hidden),
        "fc_w": init(keys[12], (hidden, 1)),
        "fc_b": init(keys[13], (1, 1)),
    }

    x = jax.random.normal(keys[14], (N, in_channels), jnp.float32)

    out = jax.block_until_ready(gat_forward(x, adj, pool, params))
    ref = jax.block_until_ready(_gat_forward_ref(x, adj, pool, params))

    assert out.shape == (B, 1)
    # Tolerance accounts for bf16 MXU operands across 3 stacked layers.
    assert jnp.allclose(out, ref, rtol=5e-2, atol=5e-3), (out, ref)
    print("KERNEL_OK")
</pallas_src>

<mosaic_0001>
module attributes {stable_mosaic.version = 11 : i64} {
  func.func @_transform_kernel(%arg0: i32, %arg1: memref<16x8xf32, #tpu.memory_space<vmem>>, %arg2: memref<8x36xbf16, #tpu.memory_space<vmem>>, %arg3: memref<1x36xf32, #tpu.memory_space<vmem>>, %arg4: memref<4x8xbf16, #tpu.memory_space<vmem>>, %arg5: memref<8x4xbf16, #tpu.memory_space<vmem>>, %arg6: memref<16x36xbf16, #tpu.memory_space<vmem>>, %arg7: memref<4x16xf32, #tpu.memory_space<vmem>>, %arg8: memref<16x4xf32, #tpu.memory_space<vmem>>) attributes {dimension_semantics = [#tpu.dimension_semantics<parallel>], iteration_bounds = array<i64: 1>, scalar_prefetch = 0 : i64, scratch_operands = 0 : i64, tpu.core_type = #tpu.core_type<tc>, window_params = [{transform_indices = @transform_0, window_bounds = array<i64: 16, 8>}, {pipeline_mode = #tpu.pipeline_mode<synchronous>, transform_indices = @transform_1, window_bounds = array<i64: 8, 36>}, {pipeline_mode = #tpu.pipeline_mode<synchronous>, transform_indices = @transform_2, window_bounds = array<i64: 1, 36>}, {pipeline_mode = #tpu.pipeline_mode<synchronous>, transform_indices = @transform_3, window_bounds = array<i64: 4, 8>}, {pipeline_mode = #tpu.pipeline_mode<synchronous>, transform_indices = @transform_4, window_bounds = array<i64: 8, 4>}, {transform_indices = @transform_5, window_bounds = array<i64: 16, 36>}, {transform_indices = @transform_6, window_bounds = array<i64: 4, 16>}, {transform_indices = @transform_7, window_bounds = array<i64: 16, 4>}]} {
    %c0 = arith.constant 0 : index
    %c0_0 = arith.constant 0 : index
    %0 = vector.load %arg1[%c0, %c0_0] : memref<16x8xf32, #tpu.memory_space<vmem>>, vector<16x8xf32>
    %1 = arith.truncf %0 : vector<16x8xf32> to vector<16x8xbf16>
    %c0_1 = arith.constant 0 : index
    %c0_2 = arith.constant 0 : index
    %2 = vector.load %arg2[%c0_1, %c0_2] : memref<8x36xbf16, #tpu.memory_space<vmem>>, vector<8x36xbf16>
    %cst = arith.constant dense<0.000000e+00> : vector<16x36xf32>
    %3 = tpu.matmul %1, %2, %cst {dimension_numbers = #tpu.dot_dimension_numbers<[1], [0], [0], [1], [0, 0, 1, 1], [], []>} : vector<16x8xbf16>, vector<8x36xbf16>, vector<16x36xf32> -> vector<16x36xf32>
    %c0_3 = arith.constant 0 : index
    %c0_4 = arith.constant 0 : index
    %4 = vector.load %arg3[%c0_3, %c0_4] : memref<1x36xf32, #tpu.memory_space<vmem>>, vector<1x36xf32>
    %5 = vector.broadcast %4 : vector<1x36xf32> to vector<16x36xf32>
    %6 = arith.addf %3, %5 : vector<16x36xf32>
    %7 = arith.truncf %6 : vector<16x36xf32> to vector<16x36xbf16>
    %c0_5 = arith.constant 0 : index
    %c0_6 = arith.constant 0 : index
    %8 = vector.load %arg6[%c0_5, %c0_6] : memref<16x36xbf16, #tpu.memory_space<vmem>>, vector<16x36xbf16>
    tpu.vector_store %arg6[%c0_5, %c0_6], %7 {strides = array<i32>} : memref<16x36xbf16, #tpu.memory_space<vmem>>, vector<16x36xbf16>,
    %c0_7 = arith.constant 0 : index
    %c0_8 = arith.constant 0 : index
    %9 = vector.load %arg4[%c0_7, %c0_8] : memref<4x8xbf16, #tpu.memory_space<vmem>>, vector<4x8xbf16>
    %cst_9 = arith.constant dense<0.000000e+00> : vector<4x16xf32>
    %10 = tpu.matmul %9, %1, %cst_9 {dimension_numbers = #tpu.dot_dimension_numbers<[1], [1], [0], [0], [0, 0, 1, 0], [], []>} : vector<4x8xbf16>, vector<16x8xbf16>, vector<4x16xf32> -> vector<4x16xf32>
    %c0_10 = arith.constant 0 : index
    %c0_11 = arith.constant 0 : index
    %11 = vector.load %arg7[%c0_10, %c0_11] : memref<4x16xf32, #tpu.memory_space<vmem>>, vector<4x16xf32>
    tpu.vector_store %arg7[%c0_10, %c0_11], %10 {strides = array<i32>} : memref<4x16xf32, #tpu.memory_space<vmem>>, vector<4x16xf32>,
    %c0_12 = arith.constant 0 : index
    %c0_13 = arith.constant 0 : index
    %12 = vector.load %arg5[%c0_12, %c0_13] : memref<8x4xbf16, #tpu.memory_space<vmem>>, vector<8x4xbf16>
    %cst_14 = arith.constant dense<0.000000e+00> : vector<16x4xf32>
    %13 = tpu.matmul %1, %12, %cst_14 {dimension_numbers = #tpu.dot_dimension_numbers<[1], [0], [0], [1], [0, 0, 1, 1], [], []>} : vector<16x8xbf16>, vector<8x4xbf16>, vector<16x4xf32> -> vector<16x4xf32>
    %c0_15 = arith.constant 0 : index
    %c0_16 = arith.constant 0 : index
    %14 = vector.load %arg8[%c0_15, %c0_16] : memref<16x4xf32, #tpu.memory_space<vmem>>, vector<16x4xf32>
    tpu.vector_store %arg8[%c0_15, %c0_16], %13 {strides = array<i32>} : memref<16x4xf32, #tpu.memory_space<vmem>>, vector<16x4xf32>,
    return
  }
  func.func @transform_0(%arg0: i32) -> (i32, i32) {
    %c0_i32 = arith.constant 0 : i32
    %c0_i32_0 = arith.constant 0 : i32
    return %arg0, %c0_i32 : i32, i32
  }
  func.func @transform_1(%arg0: i32) -> (i32, i32) {
    %c0_i32 = arith.constant 0 : i32
    %c0_i32_0 = arith.constant 0 : i32
    %c0_i32_1 = arith.constant 0 : i32
    return %c0_i32, %c0_i32_0 : i32, i32
  }
  func.func @transform_2(%arg0: i32) -> (i32, i32) {
    %c0_i32 = arith.constant 0 : i32
    %c0_i32_0 = arith.constant 0 : i32
    %c0_i32_1 = arith.constant 0 : i32
    return %c0_i32, %c0_i32_0 : i32, i32
  }
  func.func @transform_3(%arg0: i32) -> (i32, i32) {
    %c0_i32 = arith.constant 0 : i32
    %c0_i32_0 = arith.constant 0 : i32
    %c0_i32_1 = arith.constant 0 : i32
    return %c0_i32, %c0_i32_0 : i32, i32
  }
  func.func @transform_4(%arg0: i32) -> (i32, i32) {
    %c0_i32 = arith.constant 0 : i32
    %c0_i32_0 = arith.constant 0 : i32
    %c0_i32_1 = arith.constant 0 : i32
    return %c0_i32, %c0_i32_0 : i32, i32
  }
  func.func @transform_5(%arg0: i32) -> (i32, i32) {
    %c0_i32 = arith.constant 0 : i32
    %c0_i32_0 = arith.constant 0 : i32
    return %arg0, %c0_i32 : i32, i32
  }
  func.func @transform_6(%arg0: i32) -> (i32, i32) {
    %c0_i32 = arith.constant 0 : i32
    %c0_i32_0 = arith.constant 0 : i32
    return %c0_i32, %arg0 : i32, i32
  }
  func.func @transform_7(%arg0: i32) -> (i32, i32) {
    %c0_i32 = arith.constant 0 : i32
    %c0_i32_0 = arith.constant 0 : i32
    return %arg0, %c0_i32 : i32, i32
  }
}

</mosaic_0001>

<bundles_post_ra>
// kernel: tpu_custom_call.1
= control target key start
LH: loop header
LB: loop body
LE: loop exit
PB: predicated region body
PF: predicated region fallthrough
CT: control target
= control target key end

     0   :  { %13 = vsyncpa [#allocation3], 0  ;;  %vm41_vm0 = vcmask 1043456   ;;  %v307_v2 = vmov 0.0   ;;  %vm37_vm1 = vcmask 64512   ;;  %vm308_vm2 = vmmov 0   ;;  %s398_s0 = inlined_call_operand.vmem [shape: f32[16,8], index: 0, kind: input, shape index: {}]   ;;  %s399_s1 = inlined_call_operand.vmem [shape: bf16[8,36], index: 1, kind: input, shape index: {}]   ;;  %s400_s2 = inlined_call_operand.vmem [shape: f32[1,36], index: 2, kind: input, shape index: {}]   ;;  %s401_s3 = inlined_call_operand.vmem [shape: bf16[4,8], index: 3, kind: input, shape index: {}]   ;;  %s402_s4 = inlined_call_operand.vmem [shape: bf16[8,4], index: 4, kind: input, shape index: {}]   ;;  %s403_s5 = inlined_call_operand.hbm [shape: bf16[16,36], index: 5, kind: output, shape index: {0}]   ;;  %s404_s6 = inlined_call_operand.hbm [shape: f32[4,16], index: 6, kind: output, shape index: {1}]   ;;  %s405_s7 = inlined_call_operand.vmem [shape: f32[16,4], index: 7, kind: output, shape index: {2}]  }
   0x1   :  { %v29_v0 = vld [vmem:[%s399_s1] sm:$0xf]  ;;  %239 = vmatprep.subr.bf16.mxu0 %v307_v2  ;;  %245 = vmatprep.subr.bf16.mxu1 %v307_v2  ;;  %v27_v5 = vld [vmem:[%s398_s0 + $0x8] sm:$0xff] }
   0x2   :  { %v143_v1 = vld [vmem:[%s402_s4] sm:$0xf]  ;;  %v43_v3 = vsel %vm41_vm0, %v29_v0, 0  ;;  %241 = vmatprep.mubr.msk.bf16.mxu0 %vm308_vm2, %v307_v2 }
   0x3   :  { %v26_v4 = vld [vmem:[%s398_s0] sm:$0xff]  ;;  %240 = vmatpush3.bf16.msra.mxu0 %v43_v3 }
   0x4   :  { %v28_v6 = vpack.c.bf16 %v27_v5, %v26_v4 }
   0x5   :  { %14 = vsyncpa [#allocation5], 0  ;;  %v145_v7 = vsel %vm41_vm0, %v143_v1, 0  ;;  %251 = vmatprep.subr.bf16.mxu0 %v307_v2  ;;  %247 = vmatprep.mubr.msk.bf16.mxu1 %vm308_vm2, %v307_v2  ;;  %v97_v9 = vld [vmem:[%s401_s3] sm:$0x3]  ;;  %vm94_vm3 = vcmask 289792  }
   0x6   :  { %v39_v8 = vsel %vm37_vm1, %v28_v6, 0  ;;  %242 = vmatmul.mubr.msk.bf16.vlgmr.msra.gmra.mxu0 %vm37_vm1, %v28_v6  ;;  %v225_v10 = vld [vmem:[%s400_s2] ss:$0 sm:$0xff]  ;;  %s309_s10 = smov [#allocation2]   ;;  %s310_s12 = smov [#allocation4]   ;;  %vm141_vm4 = vcmask 125952  }
   0x7   :  { %246 = vmatpush3.bf16.xpose.msra.mxu1 %v39_v8  ;;  %252 = vmatpush3.bf16.msra.mxu0 %v145_v7  ;;  %s196_s11 = sshll.u32 %s309_s10, 4  ;;  %s209_s13 = sshll.u32 %s310_s12, 4  ;;  %vm188_vm5 = vcmask 31744   ;;  %s376_s11 = int_to_ptr.vmem [resolvable:$true] %s196_s11  ;;  %s210_s13 = int_to_ptr.vmem [resolvable:$true] %s209_s13 }
   0x8   :  { %253 = vmatprep.mubr.msk.bf16.mxu0 %vm308_vm2, %v307_v2  ;;  %s263_s14 = scalar_lea.vmem %s210_s13, 64  ;;  %p268_p1 = scmp.lt.s32.totalorder %s210_s13, %s210_s13 }
   0x9   :  { %p264_p0 = scmp.ne.s32.totalorder %s210_s13, %s263_s14  ;;  %p269_p2 = scmp.lt.s32.totalorder %s263_s14, %s263_s14 }
   0xb   :  { %p270_p3 = por %p269_p2, %p268_p1 }
   0xd   :  { %p271_p4 = pnand %p270_p3, %p264_p0 }
   0xe   :  { %248 = vmatmul.mubr.msk.bf16.vlgmr.msra.gmra.mxu1 %vm37_vm1, %v97_v9  ;;  %254 = vmatmul.mubr.msk.bf16.vlgmr.msra.gmra.mxu0 %vm37_vm1, %v28_v6 }
  0xc6   :  { %v79_v11 = vpop.f32.mrf.mxu0 }
  0xc7   :  { %v80_v12 = vadd.f32 %v225_v10, %v79_v11 }
  0xc8   :  { %v243_v13 = vpop.f32.mrf.mxu0 }
  0xc9   :  { %v231_v14 = vpack.c.bf16 %v80_v12, %v80_v12 }
  0xca   :  { %v82_v15 = vpop.f32.mrf.mxu0 }
  0xcb   :  { %95 = vst.msk [vmem:[#allocation2] sm:$0xf] %vm94_vm3, %v231_v14  ;;  %v83_v16 = vadd.f32 %v225_v10, %v82_v15 }
  0xcc   :  { %v244_v17 = vpop.f32.mrf.mxu0 }
  0xcd   :  { %v232_v18 = vpack.c.bf16 %v83_v16, %v83_v16 }
  0xce   :  { %v135_v19 = vpop.f32.mrf.mxu1  ;;  %v181_v20 = vpop.f32.mrf.mxu0 }
  0xcf   :  { %142 = vst.msk [vmem:[#allocation4] sm:$0xf] %vm141_vm4, %v135_v19 }
  0xd0   :  { %96 = vst.msk [vmem:[#allocation2 + $0x4] sm:$0xf] %vm94_vm3, %v232_v18  ;;  %v249_v21 = vpop.f32.mrf.mxu1 }
  0xd1   :  { %189 = vst.msk [vmem:[%s405_s7] sm:$0xff] %vm188_vm5, %v181_v20 }
  0xd2   :  { %274 = shalt.err (!%p271_p4)
}
  0xd3   :  { %212 = dma.vmem_to_hbm [thread:$0]  %s210_s13, 64, %s404_s6, [#allocation5]   ;;  %v255_v22 = vpop.f32.mrf.mxu0 }
  0xd4   :  { %s283_s17 = scalar_lea.vmem %s376_s11, 128  ;;  %p288_p6 = scmp.lt.s32.totalorder %s376_s11, %s376_s11 }
  0xd5   :  { %p284_p5 = scmp.ne.s32.totalorder %s376_s11, %s283_s17  ;;  %p289_p7 = scmp.lt.s32.totalorder %s283_s17, %s283_s17 }
  0xd7   :  { %p290_p8 = por %p289_p7, %p288_p6 }
  0xd9   :  { %p291_p9 = pnand %p290_p8, %p284_p5 }
  0xdb   :  { %294 = shalt.err (!%p291_p9)
}
  0xdc   :  { %s311_s18 = smov 64   ;;  %s312_s19 = smov 4   ;;  %v138_v23 = vpop.f32.mrf.mxu1  ;;  %v184_v24 = vpop.f32.mrf.mxu0 }
  0xdd   :  { %202 = dma.vmem_to_hbm [thread:$0]  %s376_s11, 128, %s403_s5, [#allocation3], %s311_s18, %s311_s18, %s312_s19  }
  0xde   :  { %v250_v25 = vpop.f32.mrf.mxu1  ;;  %190 = vst.msk [vmem:[%s405_s7 + $0x8] sm:$0xff] %vm188_vm5, %v184_v24  ;;  %v256_v26 = vpop.f32.mrf.mxu0 }
  0xdf   :  { %303 = dma.done.wait [#allocation3], 128  }
  0xe0   :  { %304 = vsyncadd [#allocation3], 4294967168 }
  0xe1   :  { %305 = dma.done.wait [#allocation5], 64  }
  0xe2   :  { %306 = vsyncadd [#allocation5], 4294967232 }
  0xe3   :  { %223 = vsyncpa [#allocation3], 1 }
  0xe4   :  { %224 = vsyncpa [#allocation5], 1 }

</bundles_post_ra>
